<compile_context>
chip_gen: v6e
topology: v6e:2x2x1
jax: 0.10.0
libtpu: 0.0.40
codegen_flags: <defaults>
</compile_context>

<pallas_src>
import functools

import jax
import jax.numpy as jnp
from jax import lax
from jax.experimental import pallas as pl
from jax.experimental.pallas import tpu as pltpu


_LANES = 128
_MXU_HW_MAX = 1024            # whole-row MXU ones-reduce up to this many spatial elems
_FOLD_HW_TILE = 1024          # lane chunk per grid step for very large spatial maps
_TOTAL_VMEM_BUDGET = 24 * 1024 * 1024   # budget for in/out double buffers + accumulator
_VMEM_MARGIN = 8 * 1024 * 1024          # headroom for compiler-internal scratch


def _round_up(v, m):
    return ((v + m - 1) // m) * m


def _round_down(v, m):
    return (v // m) * m


def _global_avg_mxu_kernel(x_ref, o_ref, *, hw, precision):
    # x_ref: (row_tile, hw) block.  Row sum via MXU ones-matmul: the cross-lane
    # reduce rides the vector-extended slot instead of the XLU every step.
    x = x_ref[...]
    ones = jnp.ones((hw, _LANES), dtype=x.dtype)   # loop-invariant constant
    s = jnp.dot(x, ones, preferred_element_type=jnp.float32, precision=precision)
    o_ref[...] = (s[:, :1] * jnp.float32(1.0 / hw)).astype(o_ref.dtype)


def _global_avg_fold_kernel(x_ref, o_ref, acc_ref, *, hw, hw_tile, rem):
    # x_ref: (row_tile, hw_tile) block; acc_ref: lane-dense (row_tile, 128) f32
    # running partial sums.  Per step: only VPU adds.  XLU 128->1 reduce happens
    # once per row block at the last HW step.
    k = pl.program_id(1)
    last = pl.num_programs(1) - 1

    @pl.when(k == 0)
    def _():
        acc_ref[...] = jnp.zeros_like(acc_ref)

    def _accumulate(x):
        partial = acc_ref[...]
        for j in range(hw_tile // _LANES):
            partial = partial + x[:, j * _LANES:(j + 1) * _LANES].astype(jnp.float32)
        acc_ref[...] = partial

    if rem:
        # Only the final HW block is ragged; mask its garbage lanes there only.
        @pl.when(k != last)
        def _():
            _accumulate(x_ref[...])

        @pl.when(k == last)
        def _():
            x = x_ref[...]
            lane = lax.broadcasted_iota(jnp.int32, x.shape, 1)
            _accumulate(jnp.where(lane < rem, x, jnp.zeros_like(x)))
    else:
        _accumulate(x_ref[...])

    @pl.when(k == last)
    def _():
        total = jnp.sum(acc_ref[...], axis=-1, keepdims=True)  # one XLU reduce / row block
        o_ref[...] = (total * jnp.float32(1.0 / hw)).astype(o_ref.dtype)


def select_adaptive_pool2d(x, pool_type="avg", output_size=1,
                           vmem_budget=_TOTAL_VMEM_BUDGET):
    """Pallas equivalent of SelectAdaptivePool2d(output_size=1, pool_type='avg').

    x: (N, C, H, W) array (NCHW, matching the PyTorch module).
    Returns: (N, C, 1, 1) array, same dtype as x.
    """
    assert pool_type == "avg", "only the default 'avg' pool is implemented"
    # TODO(synk): 'max', 'avgmax', 'catavgmax' variants not implemented (only a
    # different reduction op; the module's default config uses 'avg').
    assert output_size == 1, "only global pooling (output_size=1) is implemented"

    n, c, h, w = x.shape
    rows = n * c
    hw = h * w
    itemsize = jnp.dtype(x.dtype).itemsize

    x2d = x.reshape(rows, hw)  # free reshape of contiguous NCHW

    # Dtype-aware sublane granularity: 8 rows (f32), 16 (bf16/f16), 32 (int8/fp8).
    min_rows = max(8, 32 // itemsize)

    # ---- reduction-axis (HW) plan -----------------------------------------
    fold_mode = hw > _MXU_HW_MAX
    if fold_mode:
        hw_tile = _FOLD_HW_TILE
        hw_steps = pl.cdiv(hw, hw_tile)
        rem = hw - (hw_steps - 1) * hw_tile        # valid lanes in final HW block
        if rem == hw_tile:
            rem = 0                                # evenly divided: no mask needed
    else:
        hw_tile = hw
        hw_steps = 1
        rem = 0

    # ---- row (N*C) tiling ---------------------------------------------------
    lane_row = _round_up(hw_tile, _LANES)          # VMEM lanes per row of input block
    # Per-row VMEM footprint: double-buffered input + double-buffered (lane-padded)
    # output block + f32 accumulator (fold mode only).
    per_row = 2 * lane_row * itemsize + 2 * _LANES * itemsize
    if fold_mode:
        per_row += _LANES * 4

    if rows <= min_rows:
        row_tile = rows                            # single full-extent block
    else:
        cap_vmem = max(min_rows, _round_down(vmem_budget // per_row, min_rows))
        # Target >= ~4 row steps (>= 2 per v7x TensorCore) while keeping each
        # input block >= ~2 MiB so per-step fixed overhead stays amortized.
        min_block_rows = max(
            min_rows,
            _round_down((2 * 1024 * 1024) // (lane_row * itemsize), min_rows))
        step_rows = _round_up(pl.cdiv(rows, 4), min_rows)
        row_tile = min(cap_vmem, max(min_block_rows, step_rows))
        row_tile = max(min_rows, _round_down(row_tile, min_rows))
        if row_tile > rows:
            row_tile = max(min_rows, _round_down(rows, min_rows))

    row_steps = pl.cdiv(rows, row_tile)            # ragged final row block is fine

    # ---- VMEM accounting / compiler params ---------------------------------
    in_block_bytes = row_tile * lane_row * itemsize
    out_block_bytes = row_tile * _LANES * itemsize
    acc_bytes = row_tile * _LANES * 4 if fold_mode else 0
    ones_bytes = 0 if fold_mode else _round_up(hw, 8) * _LANES * itemsize
    vmem_limit = (2 * in_block_bytes + 2 * out_block_bytes
                  + acc_bytes + ones_bytes + _VMEM_MARGIN)

    cost = pl.CostEstimate(
        flops=2 * rows * hw,
        transcendentals=0,
        bytes_accessed=rows * hw * itemsize + rows * itemsize,
    )

    if fold_mode:
        kernel = functools.partial(
            _global_avg_fold_kernel, hw=hw, hw_tile=hw_tile, rem=rem)
        out2d = pl.pallas_call(
            kernel,
            out_shape=jax.ShapeDtypeStruct((rows, 1), x.dtype),
            grid_spec=pltpu.PrefetchScalarGridSpec(
                num_scalar_prefetch=0,
                grid=(row_steps, hw_steps),
                in_specs=[pl.BlockSpec((row_tile, hw_tile), lambda i, k: (i, k))],
                out_specs=pl.BlockSpec((row_tile, 1), lambda i, k: (i, 0)),
                scratch_shapes=[pltpu.VMEM((row_tile, _LANES), jnp.float32)],
            ),
            compiler_params=pltpu.CompilerParams(
                dimension_semantics=("parallel", "arbitrary"),
                vmem_limit_bytes=vmem_limit,
            ),
            cost_estimate=cost,
        )(x2d)
    else:
        precision = (lax.Precision.DEFAULT if x.dtype == jnp.bfloat16
                     else lax.Precision.HIGHEST)
        kernel = functools.partial(
            _global_avg_mxu_kernel, hw=hw, precision=precision)
        out2d = pl.pallas_call(
            kernel,
            out_shape=jax.ShapeDtypeStruct((rows, 1), x.dtype),
            grid_spec=pltpu.PrefetchScalarGridSpec(
                num_scalar_prefetch=0,
                grid=(row_steps,),
                in_specs=[pl.BlockSpec((row_tile, hw_tile), lambda i: (i, 0))],
                out_specs=pl.BlockSpec((row_tile, 1), lambda i: (i, 0)),
            ),
            compiler_params=pltpu.CompilerParams(
                dimension_semantics=("parallel",),
                vmem_limit_bytes=vmem_limit,
            ),
            cost_estimate=cost,
        )(x2d)

    return out2d.reshape(n, c, 1, 1)


if __name__ == "__main__":
    key = jax.random.PRNGKey(0)

    # 1) Small f32 NCHW input (MXU ones-reduce path).
    x = jax.random.normal(key, (2, 4, 16, 16), dtype=jnp.float32)
    y = jax.block_until_ready(select_adaptive_pool2d(x))
    ref = jnp.mean(x, axis=(2, 3), keepdims=True)
    assert y.shape == (2, 4, 1, 1), y.shape
    assert y.dtype == x.dtype, y.dtype
    assert jnp.allclose(y, ref, atol=1e-5, rtol=1e-5), "mismatch vs reference (f32)"

    # 2) bf16 input with EfficientNet-style 7x7 spatial map (hw=49, not lane-aligned).
    xb = jax.random.normal(jax.random.PRNGKey(1), (2, 16, 7, 7), dtype=jnp.bfloat16)
    yb = jax.block_until_ready(select_adaptive_pool2d(xb))
    refb = jnp.mean(xb.astype(jnp.float32), axis=(2, 3), keepdims=True)
    assert yb.shape == (2, 16, 1, 1) and yb.dtype == jnp.bfloat16
    assert jnp.allclose(yb.astype(jnp.float32), refb, atol=2e-2, rtol=2e-2), \
        "mismatch vs reference (bf16)"

    # 3) Large spatial map -> streaming fold path with a ragged, masked final HW block.
    xc = jax.random.normal(jax.random.PRNGKey(2), (1, 8, 40, 40), dtype=jnp.float32)
    yc = jax.block_until_ready(select_adaptive_pool2d(xc))
    refc = jnp.mean(xc, axis=(2, 3), keepdims=True)
    assert jnp.allclose(yc, refc, atol=1e-5, rtol=1e-5), \
        "mismatch vs reference (fold path, masked final HW block)"

    # 4) Row count not divisible by the row tile -> ragged final row block (no host pad).
    xd = jax.random.normal(jax.random.PRNGKey(3), (3, 4, 16, 16), dtype=jnp.float32)
    yd = jax.block_until_ready(select_adaptive_pool2d(xd))
    refd = jnp.mean(xd, axis=(2, 3), keepdims=True)
    assert yd.shape == (3, 4, 1, 1)
    assert jnp.allclose(yd, refd, atol=1e-5, rtol=1e-5), \
        "mismatch vs reference (ragged row blocks)"

    print("KERNEL_OK")
</pallas_src>

<mosaic_0001>
module attributes {stable_mosaic.version = 11 : i64} {
  func.func @_global_avg_mxu_kernel(%arg0: i32, %arg1: memref<8x256xf32, #tpu.memory_space<vmem>>, %arg2: memref<8x1xf32, #tpu.memory_space<vmem>>) attributes {dimension_semantics = [#tpu.dimension_semantics<parallel>], iteration_bounds = array<i64: 1>, scalar_prefetch = 0 : i64, scratch_operands = 0 : i64, tpu.core_type = #tpu.core_type<tc>, window_params = [{transform_indices = @transform_0, window_bounds = array<i64: 8, 256>}, {transform_indices = @transform_1, window_bounds = array<i64: 8, 1>}]} {
    %c0 = arith.constant 0 : index
    %c0_0 = arith.constant 0 : index
    %0 = vector.load %arg1[%c0, %c0_0] : memref<8x256xf32, #tpu.memory_space<vmem>>, vector<8x256xf32>
    %cst = arith.constant 1.000000e+00 : f32
    %1 = vector.broadcast %cst : f32 to vector<256x128xf32>
    %cst_1 = arith.constant dense<0.000000e+00> : vector<8x128xf32>
    %2 = tpu.matmul %0, %1, %cst_1 {dimension_numbers = #tpu.dot_dimension_numbers<[1], [0], [0], [1], [0, 0, 1, 1], [], []>, precision = #tpu.contract_precision<fp32>} : vector<8x256xf32>, vector<256x128xf32>, vector<8x128xf32> -> vector<8x128xf32>
    %3 = vector.extract_strided_slice %2 {offsets = [0, 0], sizes = [8, 1], strides = [1, 1]} : vector<8x128xf32> to vector<8x1xf32>
    %cst_2 = arith.constant 3.906250e-03 : f32
    %4 = vector.broadcast %cst_2 : f32 to vector<8x1xf32>
    %5 = arith.mulf %3, %4 : vector<8x1xf32>
    %c0_3 = arith.constant 0 : index
    %c0_4 = arith.constant 0 : index
    %6 = vector.load %arg2[%c0_3, %c0_4] : memref<8x1xf32, #tpu.memory_space<vmem>>, vector<8x1xf32>
    tpu.vector_store %arg2[%c0_3, %c0_4], %5 {strides = array<i32>} : memref<8x1xf32, #tpu.memory_space<vmem>>, vector<8x1xf32>,
    return
  }
  func.func @transform_0(%arg0: i32) -> (i32, i32) {
    %c0_i32 = arith.constant 0 : i32
    %c0_i32_0 = arith.constant 0 : i32
    return %arg0, %c0_i32 : i32, i32
  }
  func.func @transform_1(%arg0: i32) -> (i32, i32) {
    %c0_i32 = arith.constant 0 : i32
    %c0_i32_0 = arith.constant 0 : i32
    return %arg0, %c0_i32 : i32, i32
  }
}

</mosaic_0001>

<bundles_post_ra>
// kernel: tpu_custom_call.1
= control target key start
LH: loop header
LB: loop body
LE: loop exit
PB: predicated region body
PF: predicated region fallthrough
CT: control target
= control target key end

     0   :  { %6 = vsyncpa [#allocation3], 0  ;;  %s606_s6 = smov [#allocation2]   ;;  %s749_s0 = inlined_call_operand.hbm [shape: f32[8,256], index: 0, kind: input, shape index: {}]   ;;  %s750_s1 = inlined_call_operand.vmem [shape: f32[8,1], index: 1, kind: output, shape index: {}]  }
   0x1   :  { %s13_s7 = sshll.u32 %s606_s6, 4  ;;  %s14_s7 = int_to_ptr.vmem [resolvable:$true] %s13_s7 }
   0x2   :  { %s592_s8 = scalar_lea.vmem %s14_s7, 256  ;;  %p597_p1 = scmp.lt.s32.totalorder %s14_s7, %s14_s7 }
   0x3   :  { %p593_p0 = scmp.ne.s32.totalorder %s14_s7, %s592_s8  ;;  %p598_p2 = scmp.lt.s32.totalorder %s592_s8, %s592_s8 }
   0x5   :  { %p599_p3 = por %p598_p2, %p597_p1 }
   0x7   :  { %p600_p4 = pnand %p599_p3, %p593_p0 }
   0x9   :  { %603 = shalt.err (!%p600_p4)
}
   0xa   :  { %16 = dma.hbm_to_vmem [thread:$0]  %s749_s0, 256, %s14_s7, [#allocation3]  }
   0xb   :  { %604 = dma.done.wait [#allocation3], 256  }
   0xc   :  { %605 = vsyncadd [#allocation3], 4294967040  ;;  %v607_v0 = vmov 1.0   ;;  %v608_v1 = vmov 0.0   ;;  %v21_v2 = vld [vmem:[#allocation2 + $0x8] sm:$0xff]  ;;  %v20_v3 = vld [vmem:[#allocation2] sm:$0xff] }
   0xd   :  { %476 = vmatprep.subr.mxu0 %v607_v0  ;;  %132 = vmatprep.subr.mxu1 %v608_v1  ;;  %v633_v4 = vand.u32 4294901760, %v21_v2  ;;  %v635_v5 = vand.u32 4294901760, %v20_v3  ;;  %vm469_vm0 = vcmask 7168  }
   0xe   :  { %477 = vmatpush3.msra.mxu0 %v607_v0  ;;  %133 = vmatpush1.msra.mxu1 %v608_v1 }
   0xf   :  { %478 = vmatprep.subr.mxu0 %v607_v0  ;;  %204 = vmatprep.subr.mxu1 %v608_v1  ;;  %v641_v6 = vsub.f32 %v21_v2, %v633_v4  ;;  %v646_v7 = vsub.f32 %v20_v3, %v635_v5 }
  0x10   :  { %479 = vmatpush3.msra.mxu0 %v607_v0  ;;  %167 = vmatprep.mubr.f32.mxu1 %v633_v4 }
  0x11   :  { %480 = vmatprep.subr.mxu0 %v607_v0  ;;  %169 = vmatmul.mubr.f32.vlgmr.msra.gmra.mxu1 %v635_v5  ;;  %v88_v8 = vand.u32 4294901760, %v641_v6  ;;  %v94_v9 = vand.u32 4294901760, %v646_v7 }
  0x12   :  { %481 = vmatpush3.msra.mxu0 %v607_v0  ;;  %205 = vmatpush1.msra.mxu1 %v608_v1 }
  0x13   :  { %482 = vmatprep.subr.mxu0 %v607_v0  ;;  %240 = vmatprep.mubr.f32.mxu1 %v641_v6  ;;  %v89_v10 = vsub.f32 %v641_v6, %v88_v8  ;;  %v95_v11 = vsub.f32 %v646_v7, %v94_v9 }
  0x14   :  { %483 = vmatpush3.msra.mxu0 %v607_v0  ;;  %511 = vmatprep.subr.mxu1 %v607_v0 }
  0x15   :  { %484 = vmatprep.subr.mxu0 %v607_v0  ;;  %243 = vmatmul.mubr.f32.vlgmr.msra.gmra.mxu1 %v646_v7  ;;  %v90_v12 = vand.u32 4294901760, %v89_v10  ;;  %v96_v13 = vand.u32 4294901760, %v95_v11 }
  0x16   :  { %485 = vmatpush3.msra.mxu0 %v607_v0  ;;  %512 = vmatpush3.msra.mxu1 %v607_v0 }
  0x17   :  { %486 = vmatprep.subr.mxu0 %v607_v0  ;;  %513 = vmatprep.subr.mxu1 %v607_v0 }
  0x18   :  { %487 = vmatpush3.msra.mxu0 %v607_v0  ;;  %514 = vmatpush3.msra.mxu1 %v607_v0 }
  0x19   :  { %488 = vmatprep.subr.mxu0 %v607_v0  ;;  %515 = vmatprep.subr.mxu1 %v607_v0 }
  0x1a   :  { %489 = vmatpush3.msra.mxu0 %v607_v0  ;;  %516 = vmatpush3.msra.mxu1 %v607_v0 }
  0x1b   :  { %490 = vmatprep.subr.mxu0 %v607_v0  ;;  %517 = vmatprep.subr.mxu1 %v607_v0 }
  0x1c   :  { %491 = vmatpush3.msra.mxu0 %v607_v0  ;;  %518 = vmatpush3.msra.mxu1 %v607_v0 }
  0x1d   :  { %492 = vmatprep.subr.mxu0 %v607_v0  ;;  %519 = vmatprep.subr.mxu1 %v607_v0 }
  0x1e   :  { %493 = vmatpush3.msra.mxu0 %v607_v0  ;;  %520 = vmatpush3.msra.mxu1 %v607_v0 }
  0x1f   :  { %494 = vmatprep.subr.mxu0 %v607_v0  ;;  %521 = vmatprep.subr.mxu1 %v607_v0 }
  0x20   :  { %495 = vmatpush3.msra.mxu0 %v607_v0  ;;  %522 = vmatpush3.msra.mxu1 %v607_v0 }
  0x21   :  { %496 = vmatprep.subr.mxu0 %v607_v0  ;;  %523 = vmatprep.subr.mxu1 %v607_v0 }
  0x22   :  { %497 = vmatpush3.msra.mxu0 %v607_v0  ;;  %524 = vmatpush3.msra.mxu1 %v607_v0 }
  0x23   :  { %498 = vmatprep.subr.mxu0 %v607_v0  ;;  %525 = vmatprep.subr.mxu1 %v607_v0 }
  0x24   :  { %499 = vmatpush3.msra.mxu0 %v607_v0  ;;  %526 = vmatpush3.msra.mxu1 %v607_v0 }
  0x25   :  { %500 = vmatprep.subr.mxu0 %v607_v0  ;;  %527 = vmatprep.subr.mxu1 %v607_v0 }
  0x26   :  { %501 = vmatpush3.msra.mxu0 %v607_v0  ;;  %528 = vmatpush3.msra.mxu1 %v607_v0 }
  0x27   :  { %502 = vmatprep.subr.mxu0 %v607_v0  ;;  %91 = vmatprep.mubr.f32.mxu0 %v90_v12 }
  0x28   :  { %503 = vmatpush3.msra.mxu0 %v607_v0  ;;  %529 = vmatprep.subr.mxu1 %v607_v0 }
  0x29   :  { %504 = vmatprep.subr.mxu0 %v607_v0  ;;  %530 = vmatpush3.msra.mxu1 %v607_v0 }
  0x2a   :  { %505 = vmatpush3.msra.mxu0 %v607_v0  ;;  %531 = vmatprep.subr.mxu1 %v607_v0 }
  0x2b   :  { %506 = vmatprep.subr.mxu0 %v607_v0  ;;  %532 = vmatpush3.msra.mxu1 %v607_v0 }
  0x2c   :  { %507 = vmatpush3.msra.mxu0 %v607_v0  ;;  %533 = vmatprep.subr.mxu1 %v607_v0 }
  0x2d   :  { %97 = vmatmul.mubr.f32.vlgmr.msra.gmra.mxu0 %v96_v13  ;;  %546 = vmatprep.subr.mxu0 %v607_v0 }
  0x2e   :  { %547 = vmatpush3.msra.mxu0 %v607_v0  ;;  %534 = vmatpush3.msra.mxu1 %v607_v0 }
  0x2f   :  { %548 = vmatprep.subr.mxu0 %v607_v0  ;;  %535 = vmatprep.subr.mxu1 %v607_v0 }
  0x30   :  { %549 = vmatpush3.msra.mxu0 %v607_v0  ;;  %536 = vmatpush3.msra.mxu1 %v607_v0 }
  0x31   :  { %550 = vmatprep.subr.mxu0 %v607_v0  ;;  %537 = vmatprep.subr.mxu1 %v607_v0 }
  0x32   :  { %551 = vmatpush3.msra.mxu0 %v607_v0  ;;  %538 = vmatpush3.msra.mxu1 %v607_v0 }
  0x33   :  { %552 = vmatprep.subr.mxu0 %v607_v0  ;;  %539 = vmatprep.subr.mxu1 %v607_v0 }
  0x34   :  { %553 = vmatpush3.msra.mxu0 %v607_v0  ;;  %540 = vmatpush3.msra.mxu1 %v607_v0 }
  0x35   :  { %554 = vmatprep.subr.mxu0 %v607_v0  ;;  %541 = vmatprep.subr.mxu1 %v607_v0 }
  0x36   :  { %555 = vmatpush3.msra.mxu0 %v607_v0  ;;  %542 = vmatpush3.msra.mxu1 %v607_v0 }
  0x37   :  { %556 = vmatprep.subr.mxu0 %v607_v0  ;;  %315 = vmatprep.mubr.f32.mxu1 %v88_v8 }
  0x38   :  { %557 = vmatpush3.msra.mxu0 %v607_v0  ;;  %319 = vmatmul.mubr.f32.vlgmr.msra.gmra.mxu1 %v94_v9 }
  0x39   :  { %558 = vmatprep.subr.mxu0 %v607_v0  ;;  %354 = vmatprep.subr.mxu1 %v608_v1 }
  0x3a   :  { %559 = vmatpush3.msra.mxu0 %v607_v0  ;;  %355 = vmatpush1.msra.mxu1 %v608_v1 }
  0x3b   :  { %560 = vmatprep.subr.mxu0 %v607_v0  ;;  %389 = vmatprep.mubr.f32.mxu1 %v633_v4 }
  0x3c   :  { %561 = vmatpush3.msra.mxu0 %v607_v0  ;;  %391 = vmatmul.mubr.f32.vlgmr.msra.gmra.mxu1 %v635_v5 }
  0x3d   :  { %562 = vmatprep.subr.mxu0 %v607_v0  ;;  %461 = vmatprep.mubr.f32.mxu0 %v633_v4 }
  0x3e   :  { %563 = vmatpush3.msra.mxu0 %v607_v0 }
  0x3f   :  { %564 = vmatprep.subr.mxu0 %v607_v0 }
  0x40   :  { %565 = vmatpush3.msra.mxu0 %v607_v0 }
  0x41   :  { %566 = vmatprep.subr.mxu0 %v607_v0 }
  0x42   :  { %567 = vmatpush3.msra.mxu0 %v607_v0 }
  0x43   :  { %568 = vmatprep.subr.mxu0 %v607_v0 }
  0x44   :  { %569 = vmatpush3.msra.mxu0 %v607_v0 }
  0x45   :  { %570 = vmatprep.subr.mxu0 %v607_v0 }
  0x46   :  { %571 = vmatpush3.msra.mxu0 %v607_v0 }
  0x47   :  { %572 = vmatprep.subr.mxu0 %v607_v0 }
  0x48   :  { %573 = vmatpush3.msra.mxu0 %v607_v0 }
  0x49   :  { %574 = vmatprep.subr.mxu0 %v607_v0 }
  0x4a   :  { %575 = vmatpush3.msra.mxu0 %v607_v0 }
  0x4b   :  { %576 = vmatprep.subr.mxu0 %v607_v0 }
  0x4c   :  { %577 = vmatpush3.msra.mxu0 %v607_v0 }
  0x4d   :  { %463 = vmatmul.mubr.f32.vlgmr.msra.gmra.mxu0 %v635_v5 }
  0xd1   :  { %v170_v14 = vpop.f32.mrf.mxu1 }
  0xd3   :  { %v172_v15 = vpop.f32.mrf.mxu1 }
  0xd5   :  { %v244_v16 = vpop.f32.mrf.mxu1 }
  0xd7   :  { %v246_v17 = vpop.f32.mrf.mxu1 }
  0xed   :  { %v508_v19 = vpop.f32.mrf.mxu0 }
  0xef   :  { %v509_v22 = vpop.f32.mrf.mxu0 }
  0xf0   :  { %v510_v24 = vadd.f32 %v509_v22, %v508_v19 }
  0xf2   :  { %v171_v25 = vadd.f32 %v510_v24, %v170_v14 }
  0xf4   :  { %v245_v27 = vadd.f32 %v244_v16, %v171_v25 }
  0xf8   :  { %v543_v18 = vpop.f32.mrf.mxu1 }
  0xfa   :  { %v544_v20 = vpop.f32.mrf.mxu1 }
  0xfb   :  { %v545_v26 = vadd.f32 %v544_v20, %v543_v18 }
  0xfc   :  { %v392_v21 = vpop.f32.mrf.mxu1 }
  0xfd   :  { %v321_v28 = vadd.f32 %v545_v26, %v245_v27 }
  0xfe   :  { %v394_v23 = vpop.f32.mrf.mxu1 }
  0xff   :  { %v393_v31 = vadd.f32 %v392_v21, %v321_v28 }
 0x10d   :  { %v578_v29 = vpop.f32.mrf.mxu0 }
 0x10f   :  { %v579_v30 = vpop.f32.mrf.mxu0 }
 0x110   :  { %v580_v32 = vadd.f32 %v579_v30, %v578_v29 }
 0x112   :  { %v465_v33 = vadd.f32 %v580_v32, %v393_v31 }
 0x114   :  { %v468_v34 = vmul.f32 0.00390625, %v465_v33 }
 0x116   :  { %470 = vst.msk [vmem:[%s750_s1] sm:$0xff] %vm469_vm0, %v468_v34 }
 0x117   :  { %475 = vsyncpa [#allocation3], 1 }

</bundles_post_ra>
